<compile_context>
chip_gen: v7x
topology: tpu7x:2x2x1
jax: 0.10.0
libtpu: 0.0.40
codegen_flags: <defaults>
</compile_context>

<pallas_src>
import jax
import jax.numpy as jnp
from jax.experimental import pallas as pl
from jax.experimental.pallas import tpu as pltpu

_D = 0.01                       # smoothing threshold from the module
_INV_2D = 1.0 / (2.0 * _D)      # hoisted constant: multiply instead of divide

_LANE = 128


def _pick_block_budget():
    """(target_block_bytes, vmem_limit_bytes) per TPU generation.

    v5e/v6e have 128 MiB VMEM per TensorCore -> 8 MiB blocks (32 MiB of
    double-buffered in+out buffers) amortize the per-step cost to ~3%.
    v7x has only 64 MiB per TC -> cap blocks at 4 MiB (16 MiB of buffers)
    and keep headroom under a 32 MiB scoped limit.  Unknown -> conservative.
    """
    try:
        info = pltpu.get_tpu_info()
        vmem = getattr(info, "vmem_capacity_bytes", None)
        if vmem is not None and vmem >= 96 * 1024 * 1024:
            return 8 * 1024 * 1024, 40 * 1024 * 1024
    except Exception:
        pass
    return 4 * 1024 * 1024, 32 * 1024 * 1024


def _srelu_kernel(z_ref, o_ref):
    z = z_ref[...]
    d = jnp.asarray(_D, dtype=z.dtype)
    inv_2d = jnp.asarray(_INV_2D, dtype=z.dtype)
    quad = z * z * inv_2d                       # VALU-only, no EUP divide
    # z >= d -> z ; z <= 0 -> 0 ; else -> z^2 / (2d)
    o_ref[...] = jnp.where(z >= d, z, jnp.where(z <= 0.0, jnp.zeros_like(z), quad))


def srelu_ref(z: jax.Array) -> jax.Array:
    """Pure-jnp reference (also the fused fallback for ragged sizes)."""
    d = jnp.asarray(_D, dtype=z.dtype)
    return jnp.where(
        z >= d, z, jnp.where(z <= 0.0, jnp.zeros_like(z), z * z / (2.0 * d))
    )


def srelu(z: jax.Array) -> jax.Array:
    """Apply Srelu elementwise to an array of any shape via a Pallas kernel."""
    orig_shape = z.shape
    orig_dtype = z.dtype

    flat = z.reshape(-1)
    n = flat.shape[0]

    # Ragged sizes (not a multiple of 128 lanes): do NOT pad+unpad through HBM
    # (that costs up to ~3x the kernel's own bandwidth).  Plain jnp lets XLA
    # fuse the elementwise op instead.  Typical conv/linear activations are
    # 128-divisible and take the kernel path below.
    if n == 0 or n % _LANE != 0:
        return srelu_ref(z)

    rows = n // _LANE
    x2d = flat.reshape(rows, _LANE)              # free view, lane-dense layout

    target_block_bytes, vmem_limit_bytes = _pick_block_budget()

    # Sublane dim must be a multiple of 8 (f32) / 16 (bf16) / 32 (8-bit)
    # unless the block covers the full row extent.
    itemsize = jnp.dtype(orig_dtype).itemsize
    sublane_mult = max(8, 32 // max(itemsize, 1))
    block_rows = max(sublane_mult, target_block_bytes // (_LANE * itemsize))
    block_rows = (block_rows // sublane_mult) * sublane_mult
    if block_rows >= rows:
        block_rows = rows          # single block == full array dims (always legal)

    grid = (pl.cdiv(rows, block_rows),)  # partial last block handled by Pallas

    total_bytes = rows * _LANE * itemsize
    cost = pl.CostEstimate(
        flops=6 * rows * _LANE,        # 2 mul + 2 cmp + 2 select per element
        transcendentals=0,
        bytes_accessed=2 * total_bytes,  # one read + one write of the tensor
    )

    out2d = pl.pallas_call(
        _srelu_kernel,
        out_shape=jax.ShapeDtypeStruct((rows, _LANE), orig_dtype),
        grid_spec=pl.GridSpec(
            grid=grid,
            in_specs=[pl.BlockSpec((block_rows, _LANE), lambda i: (i, 0))],
            out_specs=pl.BlockSpec((block_rows, _LANE), lambda i: (i, 0)),
        ),
        compiler_params=pltpu.CompilerParams(
            # "parallel" lets v7x megacore shard grid steps across both TCs.
            dimension_semantics=("parallel",),
            vmem_limit_bytes=vmem_limit_bytes,
        ),
        cost_estimate=cost,
    )(x2d)

    return out2d.reshape(orig_shape)


if __name__ == "__main__":
    key = jax.random.PRNGKey(0)
    # NCHW input, small shape consistent with a conv-style activation map.
    x = jax.random.normal(key, (2, 4, 16, 16), dtype=jnp.float32) * 0.05

    y = srelu(x)
    jax.block_until_ready(y)

    y_ref = srelu_ref(x)
    assert y.shape == x.shape and y.dtype == x.dtype
    assert jnp.allclose(y, y_ref, atol=1e-6, rtol=1e-6), "mismatch vs reference"

    print("KERNEL_OK")
</pallas_src>

<mosaic_0001>
module attributes {stable_mosaic.version = 11 : i64} {
  func.func @_srelu_kernel(%arg0: i32, %arg1: memref<16x128xf32, #tpu.memory_space<vmem>>, %arg2: memref<16x128xf32, #tpu.memory_space<vmem>>) attributes {dimension_semantics = [#tpu.dimension_semantics<parallel>], iteration_bounds = array<i64: 1>, scalar_prefetch = 0 : i64, scratch_operands = 0 : i64, tpu.core_type = #tpu.core_type<tc>, window_params = [{transform_indices = @transform_0, window_bounds = array<i64: 16, 128>}, {transform_indices = @transform_1, window_bounds = array<i64: 16, 128>}]} {
    %c0 = arith.constant 0 : index
    %c0_0 = arith.constant 0 : index
    %0 = vector.load %arg1[%c0, %c0_0] : memref<16x128xf32, #tpu.memory_space<vmem>>, vector<16x128xf32>
    %1 = arith.mulf %0, %0 : vector<16x128xf32>
    %cst = arith.constant 5.000000e+01 : f32
    %2 = vector.broadcast %cst : f32 to vector<16x128xf32>
    %3 = arith.mulf %1, %2 : vector<16x128xf32>
    %cst_1 = arith.constant 0.00999999977 : f32
    %4 = vector.broadcast %cst_1 : f32 to vector<16x128xf32>
    %5 = arith.cmpf oge, %0, %4 : vector<16x128xf32>
    %cst_2 = arith.constant 0.000000e+00 : f32
    %6 = vector.broadcast %cst_2 : f32 to vector<16x128xf32>
    %7 = arith.cmpf ole, %0, %6 : vector<16x128xf32>
    %cst_3 = arith.constant 0.000000e+00 : f32
    %8 = vector.broadcast %cst_3 : f32 to vector<16x128xf32>
    %9 = arith.select %7, %8, %3 : vector<16x128xi1>, vector<16x128xf32>
    %10 = arith.select %5, %0, %9 : vector<16x128xi1>, vector<16x128xf32>
    %c0_4 = arith.constant 0 : index
    %c0_5 = arith.constant 0 : index
    %11 = vector.load %arg2[%c0_4, %c0_5] : memref<16x128xf32, #tpu.memory_space<vmem>>, vector<16x128xf32>
    tpu.vector_store %arg2[%c0_4, %c0_5], %10 {strides = array<i32>} : memref<16x128xf32, #tpu.memory_space<vmem>>, vector<16x128xf32>,
    return
  }
  func.func @transform_0(%arg0: i32) -> (i32, i32) {
    %c0_i32 = arith.constant 0 : i32
    %c0_i32_0 = arith.constant 0 : i32
    return %arg0, %c0_i32 : i32, i32
  }
  func.func @transform_1(%arg0: i32) -> (i32, i32) {
    %c0_i32 = arith.constant 0 : i32
    %c0_i32_0 = arith.constant 0 : i32
    return %arg0, %c0_i32 : i32, i32
  }
}

</mosaic_0001>

<bundles_post_ra>
// kernel: tpu_custom_call.1
= control target key start
LH: loop header
LB: loop body
LE: loop exit
PB: predicated region body
PF: predicated region fallthrough
CT: control target
= control target key end

     0   :  { %6 = vsyncpa [#allocation3], 0  ;;  %s152_s0 = inlined_call_operand.hbm [shape: f32[16,128], index: 0, kind: input, shape index: {}]   ;;  %s153_s1 = inlined_call_operand.hbm [shape: f32[16,128], index: 1, kind: output, shape index: {}]  }
   0x1   :  { %7 = vsyncpa [#allocation4], 0  ;;  %s108_s6 = smov [#allocation2]   ;;  %s60_s10 = scalar_lea.hbm %s152_s0, 256 }
   0x2   :  { %s13_s7 = sshll.u32 %s108_s6, 4  ;;  %p61_p0 = scmp.ne.s32.totalorder %s152_s0, %s60_s10  ;;  %s14_s7 = int_to_ptr.vmem [resolvable:$true] %s13_s7 }
   0x3   :  { %p64_p1 = scmp.lt.u32.totalorder %s60_s10, %s152_s0 }
   0x5   :  { %p66_p2 = pnand %p64_p1, %p61_p0 }
   0x7   :  { %69 = shalt.err (!%p66_p2)
}
   0x8   :  { %s70_s15 = scalar_lea.vmem %s14_s7, 256  ;;  %p75_p4 = scmp.lt.s32.totalorder %s14_s7, %s14_s7 }
   0x9   :  { %p71_p3 = scmp.ne.s32.totalorder %s14_s7, %s70_s15  ;;  %p76_p5 = scmp.lt.s32.totalorder %s70_s15, %s70_s15 }
   0xb   :  { %p77_p6 = por %p76_p5, %p75_p4 }
   0xd   :  { %p78_p7 = pnand %p77_p6, %p71_p3 }
   0xf   :  { %81 = shalt.err (!%p78_p7)
}
  0x10   :  { %s109_s16 = smov 128   ;;  %s110_s17 = smov 8  }
  0x11   :  { %19 = dma.hbm_to_vmem [thread:$0]  %s152_s0, 256, %s14_s7, [#allocation3], %s109_s16, %s109_s16, %s110_s17  }
  0x12   :  { %104 = dma.done.wait [#allocation3], 256  }
  0x13   :  { %105 = vsyncadd [#allocation3], 4294967040  ;;  %v23_v0 = vld [vmem:[#allocation2] sm:$0xff]  ;;  %v24_v1 = vld [vmem:[#allocation2 + $0x8] sm:$0xff]  ;;  %s111_s20 = smov [#allocation5]  }
  0x14   :  { %v25_v2 = vmul.f32 %v23_v0, %v23_v0  ;;  %v26_v3 = vmul.f32 %v24_v1, %v24_v1  ;;  %vm31_vm0 = vcmp.le.f32.partialorder %v23_v0, 0.0  ;;  %vm32_vm1 = vcmp.le.f32.partialorder %v24_v1, 0.0  ;;  %s44_s21 = sshll.u32 %s111_s20, 4  ;;  %s45_s21 = int_to_ptr.vmem [resolvable:$true] %s44_s21 }
  0x15   :  { %vm29_vm2 = vcmp.ge.f32.partialorder %v23_v0, 0.01  ;;  %vm30_vm3 = vcmp.ge.f32.partialorder %v24_v1, 0.01  ;;  %s82_s0 = scalar_lea.vmem %s45_s21, 256  ;;  %p87_p9 = scmp.lt.s32.totalorder %s45_s21, %s45_s21 }
  0x16   :  { %v27_v4 = vmul.f32 50.0, %v25_v2  ;;  %v28_v5 = vmul.f32 50.0, %v26_v3  ;;  %p83_p8 = scmp.ne.s32.totalorder %s45_s21, %s82_s0  ;;  %p88_p10 = scmp.lt.s32.totalorder %s82_s0, %s82_s0 }
  0x18   :  { %v33_v6 = vsel %vm31_vm0, 0.0, %v27_v4  ;;  %v34_v7 = vsel %vm32_vm1, 0.0, %v28_v5  ;;  %p89_p11 = por %p88_p10, %p87_p9 }
  0x19   :  { %v35_v8 = vsel %vm29_vm2, %v23_v0, %v33_v6  ;;  %v36_v9 = vsel %vm30_vm3, %v24_v1, %v34_v7 }
  0x1a   :  { %37 = vst [vmem:[#allocation5] sm:$0xff] %v35_v8  ;;  %38 = vst [vmem:[#allocation5 + $0x8] sm:$0xff] %v36_v9  ;;  %p90_p12 = pnand %p89_p11, %p83_p8 }
  0x1c   :  { %93 = shalt.err (!%p90_p12)
}
  0x1d   :  { %s94_s24 = scalar_lea.hbm %s153_s1, 256 }
  0x1e   :  { %p95_p13 = scmp.ne.s32.totalorder %s153_s1, %s94_s24  ;;  %p98_p0 = scmp.lt.u32.totalorder %s94_s24, %s153_s1 }
  0x20   :  { %p100_p1 = pnand %p98_p0, %p95_p13 }
  0x22   :  { %103 = shalt.err (!%p100_p1)
}
  0x23   :  { %50 = dma.vmem_to_hbm [thread:$0]  %s45_s21, 256, %s153_s1, [#allocation4], %s109_s16, %s109_s16, %s110_s17  }
  0x24   :  { %106 = dma.done.wait [#allocation4], 256  }
  0x25   :  { %107 = vsyncadd [#allocation4], 4294967040 }
  0x26   :  { %54 = vsyncpa [#allocation3], 1 }
  0x27   :  { %55 = vsyncpa [#allocation4], 1 }

</bundles_post_ra>
